<compile_context>
chip_gen: v7x
topology: tpu7x:2x2x1
jax: 0.10.0
libtpu: 0.0.40
codegen_flags: <defaults>
</compile_context>

<pallas_src>
import functools
import math

import jax
import jax.numpy as jnp
from jax.experimental import pallas as pl
from jax.experimental.pallas import tpu as pltpu


# ----------------------------------------------------------------------------
# Generation-aware VMEM budgeting
# ----------------------------------------------------------------------------

def _vmem_budget():
    """Return (per-input-block budget bytes, physical VMEM capacity bytes)."""
    try:
        vmem_cap = int(pltpu.get_tpu_info().vmem_capacity_bytes)
    except Exception:
        vmem_cap = 64 * 1024 * 1024  # conservative (v7x-sized) fallback
    if vmem_cap >= 100 * 1024 * 1024:
        # v5e / v6e: 128 MiB physical VMEM -> larger blocks amortize per-step cost.
        return 12 * 1024 * 1024, vmem_cap
    # v7x: 64 MiB per TensorCore -> stay conservative.
    return 4 * 1024 * 1024, vmem_cap


# ----------------------------------------------------------------------------
# Fast path: stride == kernel_size (the module's configuration: k=3, s=3, p=0)
# ----------------------------------------------------------------------------

def _avgpool_tiled_kernel(x_ref, o_ref, *, k, wp, out_w, inv_area):
    # x_ref: (rows, k*Wp) -- each row lane-packs the k input rows of one H
    #        pooling window group (rows = channel_batch * Ht).
    # o_ref: (rows, outW) -- final layout, no host-side transpose needed.
    xv = x_ref[...].astype(jnp.float32)

    # H-direction pooling: k VPU adds of the lane-packed row segments,
    # accumulated in f32 (correct for sub-f32 inputs too).
    # TODO(synk): for large Wp the non-128-aligned lane slices lower to XLU
    # rotates; a sublane-strided packing would keep this pure VPU. Noise here.
    tmp = xv[:, 0:wp]
    for j in range(1, k):
        tmp = tmp + xv[:, j * wp:(j + 1) * wp]          # (rows, Wp)

    # W-direction pooling: one MXU matmul with the pre-transposed 0/1
    # window-membership matrix (Wp, outW), generated on-chip (no input DMAs,
    # no implicit operand transpose).
    w_idx = jax.lax.broadcasted_iota(jnp.int32, (wp, out_w), 0)
    ow_idx = jax.lax.broadcasted_iota(jnp.int32, (wp, out_w), 1)
    win_start = ow_idx * k                               # stride == kernel_size here
    pwT = ((w_idx >= win_start) & (w_idx < win_start + k)).astype(jnp.float32)

    out = jnp.dot(tmp, pwT, preferred_element_type=jnp.float32)  # (rows, outW)
    o_ref[...] = (out * inv_area).astype(o_ref.dtype)


def _avgpool2d_tiled(x, k, p, outH, outW):
    """stride == kernel_size path."""
    inv_area = 1.0 / float(k * k)
    N, C, H, W = x.shape
    NC = N * C

    x3 = x.reshape(NC, H, W)
    if p > 0:
        # count_include_pad=True semantics: zero-pad, keep divisor k*k.
        x3 = jnp.pad(x3, ((0, 0), (p, p), (p, p)))
    Hp, Wp = H + 2 * p, W + 2 * p

    # Group H rows into pooling windows of k rows; pad the (unused) tail rows.
    Ht = -(-Hp // k)
    pad_h = Ht * k - Hp
    if pad_h:
        x3 = jnp.pad(x3, ((0, 0), (0, pad_h), (0, 0)))

    budget, vmem_cap = _vmem_budget()
    slab_bytes = Ht * k * Wp * x3.dtype.itemsize

    # Channel batch per grid step: one block (grid=1) whenever it fits the
    # budget -- no forced multi-step split.  Only for large NC do we tile,
    # keeping the block's sublane dim (tb*Ht) a multiple of 8.
    tb = int(max(1, min(NC, budget // max(slab_bytes, 1))))
    if tb < NC:
        g8 = 8 // math.gcd(Ht, 8)
        tb = max((tb // g8) * g8, g8)
        tb = min(tb, NC)
    grid = -(-NC // tb)
    NCp = grid * tb
    if NCp > NC:
        x3 = jnp.pad(x3, ((0, NCp - NC), (0, 0), (0, 0)))

    # Lane-pack each k-row window group: (NCp, Ht*k, Wp) -> (NCp*Ht, k*Wp).
    x2 = x3.reshape(NCp * Ht, k * Wp)

    rows = tb * Ht
    block_in_bytes = rows * k * Wp * x3.dtype.itemsize
    block_out_bytes = rows * outW * x3.dtype.itemsize
    # Double-buffered in/out blocks plus headroom; never exceed physical VMEM.
    needed = 2 * (block_in_bytes + block_out_bytes) + (2 << 20)
    vmem_limit = max(32 * 1024 * 1024, needed)
    vmem_limit = min(vmem_limit, max(vmem_cap - (4 << 20), 32 * 1024 * 1024))

    kern = functools.partial(_avgpool_tiled_kernel,
                             k=k, wp=Wp, out_w=outW, inv_area=inv_area)
    out2 = pl.pallas_call(
        kern,
        out_shape=jax.ShapeDtypeStruct((NCp * Ht, outW), x.dtype),
        grid_spec=pltpu.PrefetchScalarGridSpec(
            num_scalar_prefetch=0,
            grid=(grid,),
            in_specs=[pl.BlockSpec((rows, k * Wp), lambda i: (i, 0))],
            out_specs=pl.BlockSpec((rows, outW), lambda i: (i, 0)),
        ),
        compiler_params=pltpu.CompilerParams(
            dimension_semantics=("arbitrary",),
            vmem_limit_bytes=int(vmem_limit),
        ),
    )(x2)

    # Output is already in final row-major order.  When there is no channel or
    # H-group padding (the module's config), this reshape is contiguous/free.
    if NCp == NC and Ht == outH:
        return out2.reshape(N, C, outH, outW)
    out = out2.reshape(NCp, Ht, outW)[:NC, :outH, :]
    return out.reshape(N, C, outH, outW)


# ----------------------------------------------------------------------------
# Cold path: general (kernel_size, stride, padding)
# ----------------------------------------------------------------------------

def _make_pool_matrix(out_size, in_size, kernel_size, stride, padding):
    # P[o, i] = 1 if input index i falls in the (in-bounds part of) window o.
    o = jnp.arange(out_size)[:, None]
    i = jnp.arange(in_size)[None, :]
    start = o * stride - padding
    mask = (i >= start) & (i < start + kernel_size)
    return mask.astype(jnp.float32)


def _avgpool_matmul_kernel(ph_ref, x_ref, pwT_ref, o_ref, *, inv_area):
    x = x_ref[0, 0, :, :].astype(jnp.float32)
    t = jnp.dot(ph_ref[...], x, preferred_element_type=jnp.float32)
    o = jnp.dot(t, pwT_ref[...], preferred_element_type=jnp.float32)
    o_ref[0, 0, :, :] = (o * inv_area).astype(o_ref.dtype)


def _avgpool2d_general(x, k, s, p, outH, outW):
    # TODO(synk): cold path for stride != kernel_size; kept in the simple
    # per-(n, c) two-matmul form and not performance-tuned (the module's
    # configuration is k=3, s=3, p=0 and never reaches this path).
    N, C, H, W = x.shape
    ph = _make_pool_matrix(outH, H, k, s, p)
    pwT = _make_pool_matrix(outW, W, k, s, p).T
    inv_area = 1.0 / float(k * k)
    kern = functools.partial(_avgpool_matmul_kernel, inv_area=inv_area)
    return pl.pallas_call(
        kern,
        out_shape=jax.ShapeDtypeStruct((N, C, outH, outW), x.dtype),
        grid_spec=pltpu.PrefetchScalarGridSpec(
            num_scalar_prefetch=0,
            grid=(N, C),
            in_specs=[
                pl.BlockSpec((outH, H), lambda n, c: (0, 0)),
                pl.BlockSpec((1, 1, H, W), lambda n, c: (n, c, 0, 0)),
                pl.BlockSpec((W, outW), lambda n, c: (0, 0)),
            ],
            out_specs=pl.BlockSpec((1, 1, outH, outW), lambda n, c: (n, c, 0, 0)),
        ),
        compiler_params=pltpu.CompilerParams(
            dimension_semantics=("parallel", "parallel")),
    )(ph, x, pwT)


# ----------------------------------------------------------------------------
# Public entry point
# ----------------------------------------------------------------------------

def avgpool2d_pallas(x, kernel_size, stride=None, padding=0):
    """AvgPool2d on NCHW input, matching the reference CUDA kernel."""
    k = int(kernel_size)
    s = k if (stride is None or int(stride) <= 0) else int(stride)
    p = int(padding)
    N, C, H, W = x.shape
    outH = (H + 2 * p - k) // s + 1
    outW = (W + 2 * p - k) // s + 1
    if s == k:
        return _avgpool2d_tiled(x, k, p, outH, outW)
    return _avgpool2d_general(x, k, s, p, outH, outW)


# ----------------------------------------------------------------------------
# Pure-JAX reference (matches the CUDA kernel: sum of in-bounds / k^2)
# ----------------------------------------------------------------------------

def _reference_avgpool(x, kernel_size, stride, padding):
    N, C, H, W = x.shape
    if stride is None or stride <= 0:
        stride = kernel_size
    outH = (H + 2 * padding - kernel_size) // stride + 1
    outW = (W + 2 * padding - kernel_size) // stride + 1
    xp = jnp.pad(x, ((0, 0), (0, 0), (padding, padding), (padding, padding)))
    out = jnp.zeros((N, C, outH, outW), jnp.float32)
    for kh in range(kernel_size):
        for kw in range(kernel_size):
            out = out + xp[:, :, kh:kh + stride * outH:stride,
                                 kw:kw + stride * outW:stride].astype(jnp.float32)
    return (out / float(kernel_size * kernel_size)).astype(x.dtype)


if __name__ == "__main__":
    key = jax.random.PRNGKey(0)

    # Primary shape consistent with the module: batch=2, channels=4, spatial=24.
    kernel_size, stride, padding = 3, 3, 0
    x = jax.random.normal(key, (2, 4, 24, 24), dtype=jnp.float32)
    out = jax.block_until_ready(avgpool2d_pallas(x, kernel_size, stride, padding))
    ref = _reference_avgpool(x, kernel_size, stride, padding)
    assert out.shape == (2, 4, 8, 8), out.shape
    assert jnp.allclose(out, ref, atol=1e-5, rtol=1e-5), "mismatch vs reference"

    # Non-divisible spatial size exercises the H-tail padding/slice branch.
    x2 = jax.random.normal(jax.random.PRNGKey(1), (2, 3, 20, 20), dtype=jnp.float32)
    out2 = jax.block_until_ready(avgpool2d_pallas(x2, kernel_size, stride, padding))
    ref2 = _reference_avgpool(x2, kernel_size, stride, padding)
    assert out2.shape == ref2.shape, (out2.shape, ref2.shape)
    assert jnp.allclose(out2, ref2, atol=1e-5, rtol=1e-5), "mismatch vs reference (tail)"

    print("KERNEL_OK")
</pallas_src>

<mosaic_0001>
module attributes {stable_mosaic.version = 11 : i64} {
  func.func @_avgpool_tiled_kernel(%arg0: i32, %arg1: memref<64x72xf32, #tpu.memory_space<vmem>>, %arg2: memref<64x8xf32, #tpu.memory_space<vmem>>) attributes {dimension_semantics = [#tpu.dimension_semantics<arbitrary>], iteration_bounds = array<i64: 1>, scalar_prefetch = 0 : i64, scratch_operands = 0 : i64, tpu.core_type = #tpu.core_type<tc>, window_params = [{transform_indices = @transform_0, window_bounds = array<i64: 64, 72>}, {transform_indices = @transform_1, window_bounds = array<i64: 64, 8>}]} {
    %c0 = arith.constant 0 : index
    %c0_0 = arith.constant 0 : index
    %0 = vector.load %arg1[%c0, %c0_0] : memref<64x72xf32, #tpu.memory_space<vmem>>, vector<64x72xf32>
    %1 = vector.extract_strided_slice %0 {offsets = [0, 0], sizes = [64, 24], strides = [1, 1]} : vector<64x72xf32> to vector<64x24xf32>
    %2 = vector.extract_strided_slice %0 {offsets = [0, 24], sizes = [64, 24], strides = [1, 1]} : vector<64x72xf32> to vector<64x24xf32>
    %3 = arith.addf %1, %2 : vector<64x24xf32>
    %4 = vector.extract_strided_slice %0 {offsets = [0, 48], sizes = [64, 24], strides = [1, 1]} : vector<64x72xf32> to vector<64x24xf32>
    %5 = arith.addf %3, %4 : vector<64x24xf32>
    %6 = tpu.iota {dimensions = array<i32: 0>} : vector<24x8xi32>
    %7 = tpu.iota {dimensions = array<i32: 1>} : vector<24x8xi32>
    %c3_i32 = arith.constant 3 : i32
    %8 = vector.broadcast %c3_i32 : i32 to vector<24x8xi32>
    %9 = arith.muli %7, %8 : vector<24x8xi32>
    %10 = arith.cmpi sge, %6, %9 : vector<24x8xi32>
    %c3_i32_1 = arith.constant 3 : i32
    %11 = vector.broadcast %c3_i32_1 : i32 to vector<24x8xi32>
    %12 = arith.addi %9, %11 : vector<24x8xi32>
    %13 = arith.cmpi slt, %6, %12 : vector<24x8xi32>
    %14 = arith.andi %10, %13 : vector<24x8xi1>
    %15 = arith.extui %14 : vector<24x8xi1> to vector<24x8xi32>
    %16 = arith.sitofp %15 : vector<24x8xi32> to vector<24x8xf32>
    %cst = arith.constant dense<0.000000e+00> : vector<64x8xf32>
    %17 = tpu.matmul %5, %16, %cst {dimension_numbers = #tpu.dot_dimension_numbers<[1], [0], [0], [1], [0, 0, 1, 1], [], []>} : vector<64x24xf32>, vector<24x8xf32>, vector<64x8xf32> -> vector<64x8xf32>
    %cst_2 = arith.constant 0.111111112 : f32
    %18 = vector.broadcast %cst_2 : f32 to vector<64x8xf32>
    %19 = arith.mulf %17, %18 : vector<64x8xf32>
    %c0_3 = arith.constant 0 : index
    %c0_4 = arith.constant 0 : index
    %20 = vector.load %arg2[%c0_3, %c0_4] : memref<64x8xf32, #tpu.memory_space<vmem>>, vector<64x8xf32>
    tpu.vector_store %arg2[%c0_3, %c0_4], %19 {strides = array<i32>} : memref<64x8xf32, #tpu.memory_space<vmem>>, vector<64x8xf32>,
    return
  }
  func.func @transform_0(%arg0: i32) -> (i32, i32) {
    %c0_i32 = arith.constant 0 : i32
    %c0_i32_0 = arith.constant 0 : i32
    return %arg0, %c0_i32 : i32, i32
  }
  func.func @transform_1(%arg0: i32) -> (i32, i32) {
    %c0_i32 = arith.constant 0 : i32
    %c0_i32_0 = arith.constant 0 : i32
    return %arg0, %c0_i32 : i32, i32
  }
}

</mosaic_0001>

<bundles_post_ra>
// kernel: tpu_custom_call.1
= control target key start
LH: loop header
LB: loop body
LE: loop exit
PB: predicated region body
PF: predicated region fallthrough
CT: control target
= control target key end

     0   :  { %6 = vsyncpa [#allocation3], 0  ;;  %s359_s6 = smov [#allocation2]   ;;  %s436_s0 = inlined_call_operand.hbm [shape: f32[64,72], index: 0, kind: input, shape index: {}]   ;;  %s437_s1 = inlined_call_operand.vmem [shape: f32[64,8], index: 1, kind: output, shape index: {}]  }
   0x1   :  { %s12_s7 = sshll.u32 %s359_s6, 4  ;;  %s335_s10 = scalar_lea.hbm %s436_s0, 1024  ;;  %s13_s7 = int_to_ptr.vmem [resolvable:$true] %s12_s7 }
   0x2   :  { %p336_p0 = scmp.ne.s32.totalorder %s436_s0, %s335_s10  ;;  %p339_p1 = scmp.lt.u32.totalorder %s335_s10, %s436_s0 }
   0x4   :  { %p341_p2 = pnand %p339_p1, %p336_p0 }
   0x6   :  { %344 = shalt.err (!%p341_p2)
}
   0x7   :  { %s345_s15 = scalar_lea.vmem %s13_s7, 1024  ;;  %p350_p4 = scmp.lt.s32.totalorder %s13_s7, %s13_s7 }
   0x8   :  { %p346_p3 = scmp.ne.s32.totalorder %s13_s7, %s345_s15  ;;  %p351_p5 = scmp.lt.s32.totalorder %s345_s15, %s345_s15 }
   0xa   :  { %p352_p6 = por %p351_p5, %p350_p4 }
   0xc   :  { %p353_p7 = pnand %p352_p6, %p346_p3 }
   0xe   :  { %356 = shalt.err (!%p353_p7)
}
   0xf   :  { %s360_s16 = smov 128   ;;  %s361_s17 = smov 8  }
  0x10   :  { %18 = dma.hbm_to_vmem [thread:$0]  %s436_s0, 1024, %s13_s7, [#allocation3], %s360_s16, %s360_s16, %s361_s17  }
  0x11   :  { %357 = dma.done.wait [#allocation3], 1024  }
  0x12   :  { %358 = vsyncadd [#allocation3], 4294966272  ;;  %v102_v0 = vlaneseq  ;;  %v23_v7 = vld [vmem:[#allocation2 + $0x8] sm:$0xff]  ;;  %v22_v8 = vld [vmem:[#allocation2] sm:$0xff]  ;;  %s362_s20 = smov 104   ;;  %v364_v12 = vmov 1.0  }
  0x13   :  { %40 = vrot.lane.b32.xlu1 %v23_v7, %s362_s20  ;;  %38 = vrot.lane.b32.xlu0 %v22_v8, %s362_s20  ;;  %v27_v9 = vld [vmem:[#allocation2 + $0x28] sm:$0xff]  ;;  %v26_v10 = vld [vmem:[#allocation2 + $0x20] sm:$0xff]  ;;  %v363_v11 = vmov 1.0|1.0   ;;  %s365_s0 = smov 80   ;;  %v28_v13 = vld [vmem:[#allocation2 + $0x30] sm:$0xff] }
  0x14   :  { %v103_v1 = vshrl.u32 %v102_v0, 7  ;;  %v107_v2 = vand.u32 127, %v102_v0  ;;  %v24_v14 = vld [vmem:[#allocation2 + $0x10] sm:$0xff]  ;;  %v29_v15 = vld [vmem:[#allocation2 + $0x38] sm:$0xff]  ;;  %vm125_vm10 = vcmask 195584   ;;  %vm263_vm11 = vcmask 64512  }
  0x15   :  { %v25_v16 = vld [vmem:[#allocation2 + $0x18] sm:$0xff] }
  0x16   :  { %v104_v3 = vadd.s32 8, %v103_v1  ;;  %v108_v4 = vmul.u32 3, %v107_v2  ;;  %v105_v5 = vadd.s32 16, %v103_v1 }
  0x17   :  { %48 = vrot.lane.b32.xlu1 %v27_v9, %s362_s20  ;;  %46 = vrot.lane.b32.xlu0 %v26_v10, %s362_s20 }
  0x18   :  { %vm109_vm0 = vcmp.ge.s32.totalorder %v103_v1, %v108_v4  ;;  %v112_v6 = vadd.s32 3, %v108_v4  ;;  %vm110_vm1 = vcmp.ge.s32.totalorder %v104_v3, %v108_v4  ;;  %vm111_vm5 = vcmp.ge.s32.totalorder %v105_v5, %v108_v4 }
  0x1a   :  { %vm113_vm2 = vcmp.lt.s32.totalorder %v103_v1, %v112_v6  ;;  %vm114_vm3 = vcmp.lt.s32.totalorder %v104_v3, %v112_v6  ;;  %vm115_vm6 = vcmp.lt.s32.totalorder %v105_v5, %v112_v6 }
  0x1b   :  { %vm116_vm4 = vmand %vm109_vm0, %vm113_vm2  ;;  %78 = vrot.lane.b32.xlu1 %v26_v10, %s365_s0  ;;  %70 = vrot.lane.b32.xlu0 %v22_v8, %s365_s0 }
  0x1c   :  { %vm117_vm7 = vmand %vm110_vm1, %vm114_vm3 }
  0x1d   :  { %vm320_vm8 = vmpackc.low %vm117_vm7, %vm116_vm4 }
  0x1e   :  { %vm118_vm9 = vmand %vm111_vm5, %vm115_vm6  ;;  %321 = vmatprep.subr.msk.bf16.mxu0 %vm320_vm8, %v363_v11  ;;  %324 = vmatprep.subr.msk.bf16.mxu1 %vm320_vm8, %v363_v11 }
  0x1f   :  { %323 = vmatpush3.bf16.msk.msra.mxu0 %vm320_vm8, %v363_v11  ;;  %326 = vmatpush3.bf16.msk.msra.mxu1 %vm320_vm8, %v363_v11 }
  0x20   :  { %306 = vmatprep.subr.msk.mxu0 %vm118_vm9, %v364_v12  ;;  %325 = vmatprep.subr.msk.mxu1 %vm118_vm9, %v364_v12 }
  0x21   :  { %80 = vrot.lane.b32.xlu1 %v27_v9, %s365_s0  ;;  %72 = vrot.lane.b32.xlu0 %v23_v7, %s365_s0 }
  0x23   :  { %307 = vmatpush3.msk.msra.mxu0 %vm118_vm9, %v364_v12  ;;  %327 = vmatpush3.msk.msra.mxu1 %vm118_vm9, %v364_v12 }
  0x25   :  { %50 = vrot.lane.b32.xlu1 %v28_v13, %s362_s20  ;;  %42 = vrot.lane.b32.xlu0 %v24_v14, %s362_s20 }
  0x29   :  { %52 = vrot.lane.b32.xlu1 %v29_v15, %s362_s20  ;;  %44 = vrot.lane.b32.xlu0 %v25_v16, %s362_s20 }
  0x2d   :  { %82 = vrot.lane.b32.xlu1 %v28_v13, %s365_s0  ;;  %74 = vrot.lane.b32.xlu0 %v24_v14, %s365_s0 }
  0x31   :  { %84 = vrot.lane.b32.xlu1 %v29_v15, %s365_s0  ;;  %76 = vrot.lane.b32.xlu0 %v25_v16, %s365_s0 }
  0x85   :  { %v41_v17 = vpop.permute.xlu1 %40  ;;  %v39_v18 = vpop.permute.xlu0 %38 }
  0x86   :  { %v62_v21 = vadd.f32 %v39_v18, %v22_v8  ;;  %v63_v27 = vadd.f32 %v41_v17, %v23_v7 }
  0x89   :  { %v49_v19 = vpop.permute.xlu1 %48  ;;  %v47_v20 = vpop.permute.xlu0 %46 }
  0x8a   :  { %v66_v22 = vadd.f32 %v47_v20, %v26_v10  ;;  %v67_v28 = vadd.f32 %v49_v19, %v27_v9 }
  0x8d   :  { %v79_v23 = vpop.permute.xlu1 %78  ;;  %v71_v24 = vpop.permute.xlu0 %70 }
  0x8e   :  { %v98_v25 = vadd.f32 %v79_v23, %v66_v22  ;;  %v94_v26 = vadd.f32 %v71_v24, %v62_v21 }
  0x90   :  { %308 = vmatprep.mubr.msk.f32.mxu0 %vm125_vm10, %v94_v26  ;;  %314 = vmatprep.mubr.msk.f32.mxu1 %vm125_vm10, %v98_v25 }
  0x93   :  { %v81_v29 = vpop.permute.xlu1 %80  ;;  %v73_v30 = vpop.permute.xlu0 %72 }
  0x94   :  { %v99_v31 = vadd.f32 %v81_v29, %v67_v28  ;;  %v95_v32 = vadd.f32 %v73_v30, %v63_v27 }
  0x96   :  { %309 = vmatmul.mubr.msk.f32.vlgmr.msra.gmra.mrb[0].mxu0 %vm125_vm10, %v95_v32  ;;  %315 = vmatmul.mubr.msk.f32.vlgmr.msra.gmra.mrb[0].mxu1 %vm125_vm10, %v99_v31 }
  0x97   :  { %v51_v33 = vpop.permute.xlu1 %50  ;;  %v43_v34 = vpop.permute.xlu0 %42 }
  0x98   :  { %v68_v37 = vadd.f32 %v51_v33, %v28_v13  ;;  %v64_v38 = vadd.f32 %v43_v34, %v24_v14 }
  0x9b   :  { %v53_v35 = vpop.permute.xlu1 %52  ;;  %v45_v36 = vpop.permute.xlu0 %44 }
  0x9c   :  { %v69_v43 = vadd.f32 %v53_v35, %v29_v15  ;;  %v65_v44 = vadd.f32 %v45_v36, %v25_v16 }
  0x9f   :  { %v83_v39 = vpop.permute.xlu1 %82  ;;  %v75_v40 = vpop.permute.xlu0 %74 }
  0xa0   :  { %v100_v41 = vadd.f32 %v83_v39, %v68_v37  ;;  %v96_v42 = vadd.f32 %v75_v40, %v64_v38 }
  0xa2   :  { %311 = vmatprep.mubr.msk.f32.mxu0 %vm125_vm10, %v96_v42  ;;  %317 = vmatprep.mubr.msk.f32.mxu1 %vm125_vm10, %v100_v41 }
  0xa3   :  { %v85_v45 = vpop.permute.xlu1 %84  ;;  %v77_v46 = vpop.permute.xlu0 %76 }
  0xa4   :  { %v101_v47 = vadd.f32 %v85_v45, %v69_v43  ;;  %v97_v48 = vadd.f32 %v77_v46, %v65_v44 }
  0xa6   :  { %312 = vmatmul.mubr.msk.f32.gmra.mrb[2].mxu0 %vm125_vm10, %v97_v48  ;;  %318 = vmatmul.mubr.msk.f32.gmra.mrb[2].mxu1 %vm125_vm10, %v101_v47 }
 0x169   :  { %v310_v49 = vpop.f32.mrb[0].mxu0  ;;  %v316_v50 = vpop.f32.mrb[0].mxu1 }
 0x16a   :  { %v256_v51 = vmul.f32 0.11111111, %v310_v49  ;;  %v260_v52 = vmul.f32 0.11111111, %v316_v50  ;;  %v216_v53 = vpop.f32.mrb[1].mxu0  ;;  %v236_v54 = vpop.f32.mrb[1].mxu1 }
 0x16b   :  { %v255_v55 = vmul.f32 0.11111111, %v216_v53  ;;  %v259_v56 = vmul.f32 0.11111111, %v236_v54 }
 0x16c   :  { %265 = vst.msk [vmem:[%s437_s1 + $0x8] sm:$0xff] %vm263_vm11, %v256_v51  ;;  %269 = vst.msk [vmem:[%s437_s1 + $0x28] sm:$0xff] %vm263_vm11, %v260_v52 }
 0x16d   :  { %264 = vst.msk [vmem:[%s437_s1] sm:$0xff] %vm263_vm11, %v255_v55  ;;  %268 = vst.msk [vmem:[%s437_s1 + $0x20] sm:$0xff] %vm263_vm11, %v259_v56 }
 0x179   :  { %v313_v57 = vpop.f32.mrb[2].mxu0  ;;  %v319_v58 = vpop.f32.mrb[2].mxu1 }
 0x17a   :  { %v258_v59 = vmul.f32 0.11111111, %v313_v57  ;;  %v262_v60 = vmul.f32 0.11111111, %v319_v58  ;;  %v226_v61 = vpop.f32.mrb[3].mxu0  ;;  %v246_v62 = vpop.f32.mrb[3].mxu1 }
 0x17b   :  { %v257_v63 = vmul.f32 0.11111111, %v226_v61  ;;  %v261_v0 = vmul.f32 0.11111111, %v246_v62 }
 0x17c   :  { %267 = vst.msk [vmem:[%s437_s1 + $0x18] sm:$0xff] %vm263_vm11, %v258_v59  ;;  %271 = vst.msk [vmem:[%s437_s1 + $0x38] sm:$0xff] %vm263_vm11, %v262_v60 }
 0x17d   :  { %266 = vst.msk [vmem:[%s437_s1 + $0x10] sm:$0xff] %vm263_vm11, %v257_v63  ;;  %270 = vst.msk [vmem:[%s437_s1 + $0x30] sm:$0xff] %vm263_vm11, %v261_v0 }
 0x17e   :  { %276 = vsyncpa [#allocation3], 1 }

</bundles_post_ra>
